<compile_context>
chip_gen: v7x
topology: tpu7x:2x2x1
jax: 0.10.0
libtpu: 0.0.40
codegen_flags: <defaults>
</compile_context>

<pallas_src>
import functools

import jax
import jax.numpy as jnp
from jax.experimental import pallas as pl
from jax.experimental.pallas import tpu as pltpu


def _gelu_exact(x):
    # PyTorch F.gelu default (erf form)
    return 0.5 * x * (1.0 + jax.lax.erf(x * (1.0 / jnp.sqrt(2.0))))


def _gelu_tanh(x):
    # EUP-friendly tanh approximation (opt-in; slightly different numerics).
    return jax.nn.gelu(x, approximate=True)


def _layernorm(x, w, b, eps=1e-5):
    mu = jnp.mean(x, axis=-1, keepdims=True)
    var = jnp.mean((x - mu) ** 2, axis=-1, keepdims=True)
    return (x - mu) * jax.lax.rsqrt(var + eps) * w + b


def mixer_kernel(
    x_ref,        # (bt, P, D) streamed input block
    dp_ref,       # (5, D)  rows: ln1_w, ln1_b, ln2_w, ln2_b, b4
    cb_ref,       # (Hc+P, 1) column biases: fc1 bias then fc2 bias (patch mixer)
    w1_ref,       # (Hc, P)  patch-mix fc1 weight
    w2_ref,       # (P, Hc)  patch-mix fc2 weight
    w3t_ref,      # (D, Hs)  channel-mix fc1 weight, pre-transposed
    b3_ref,       # (1, Hs)
    w4t_ref,      # (Hs, D)  channel-mix fc2 weight, pre-transposed
    o_ref,        # (bt, P, D)
    *, matmul_dtype, approx_gelu,
):
    bt, P, D = x_ref.shape
    Hc = w1_ref.shape[0]

    gelu = _gelu_tanh if approx_gelu else _gelu_exact

    def mm(a, b):
        return jnp.dot(a.astype(matmul_dtype), b.astype(matmul_dtype),
                       preferred_element_type=jnp.float32)

    # ---- constants: loaded once per grid step ----
    ln1_w = dp_ref[0:1, :]           # (1, D)
    ln1_b = dp_ref[1:2, :]           # (1, D)
    ln2_w = dp_ref[2:3, :]           # (1, D)
    ln2_b = dp_ref[3:4, :]           # (1, D)
    b4 = dp_ref[4:5, :]              # (1, D)
    b1c = cb_ref[0:Hc, :]            # (Hc, 1)
    b2c = cb_ref[Hc:Hc + P, :]       # (P, 1)
    w1 = w1_ref[...]                 # (Hc, P)
    w2 = w2_ref[...]                 # (P, Hc)
    w3t = w3t_ref[...]               # (D, Hs)
    b3 = b3_ref[...]                 # (1, Hs)
    w4t = w4t_ref[...]               # (Hs, D)

    # ---- gather the batch block as (bt*P, D) (row-major over samples) ----
    xs = [x_ref[b] for b in range(bt)]                        # bt x (P, D)
    x2 = jnp.concatenate(xs, axis=0)                          # (bt*P, D)

    # ---- MLPblock (patch mixing), transpose-free left-multiply form ----
    #   (fc2(gelu(fc1(LN(x).T)))).T == W2 @ gelu(W1 @ LN(x) + b1_col) + b2_col
    # Fold bt into the matmul N dim by laying the LayerNorm'd slices
    # side-by-side along the lane axis.
    h2 = _layernorm(x2, ln1_w, ln1_b)                         # (bt*P, D)
    hm = jnp.concatenate(
        [h2[b * P:(b + 1) * P, :] for b in range(bt)], axis=1)  # (P, bt*D)
    a1 = gelu(mm(w1, hm) + b1c)                               # (Hc, bt*D)
    mix = mm(w2, a1) + b2c                                    # (P, bt*D)
    # back to row-major (sample, patch) layout for the residual/channel mixer
    m2 = jnp.concatenate(
        [mix[:, b * D:(b + 1) * D] for b in range(bt)], axis=0)  # (bt*P, D)
    y2 = x2 + m2                                              # (bt*P, D)

    # ---- TokenMixer (channel mixing): single folded matmuls over bt*P rows ----
    g2 = _layernorm(y2, ln2_w, ln2_b)                         # (bt*P, D)
    a2 = gelu(mm(g2, w3t) + b3)                               # (bt*P, Hs)
    out2 = y2 + mm(a2, w4t) + b4                              # (bt*P, D)

    for b in range(bt):                                       # static unroll
        o_ref[b] = out2[b * P:(b + 1) * P, :].astype(o_ref.dtype)


def mixer_layer(x, params, *, bt=1, matmul_dtype=jnp.float32, approx_gelu=False):
    """x: (B, P, D) float32.  params: PyTorch-layout weights (see init_params).

    matmul_dtype=jnp.bfloat16 routes the four matmuls through bf16 MXU inputs
    (f32 accumulation); default f32 keeps strict parity with PyTorch.
    """
    B, P, D = x.shape
    Hc = params["w1"].shape[0]
    Hs = params["w3"].shape[0]
    assert B % bt == 0, "bt must divide the batch size"

    f32 = jnp.float32
    # Host-side layout prep (free, outside the kernel):
    #   * small vectors packed into two arrays (fewer DMA descriptors)
    #   * channel-mixer weights pre-transposed to (in, out)
    dparams = jnp.stack(
        [params["ln1_w"], params["ln1_b"],
         params["ln2_w"], params["ln2_b"],
         params["b4"]], axis=0).astype(f32)                          # (5, D)
    cbias = jnp.concatenate(
        [params["b1"], params["b2"]]).reshape(Hc + P, 1).astype(f32)  # (Hc+P, 1)
    w1 = params["w1"].astype(matmul_dtype)                            # (Hc, P)
    w2 = params["w2"].astype(matmul_dtype)                            # (P, Hc)
    w3t = params["w3"].T.astype(matmul_dtype)                         # (D, Hs)
    w4t = params["w4"].T.astype(matmul_dtype)                         # (Hs, D)
    b3 = params["b3"].reshape(1, Hs).astype(f32)                      # (1, Hs)

    def const_spec(shape):
        nd = len(shape)
        # Constant across the grid; single-buffer to save VMEM.
        return pl.BlockSpec(shape, lambda i: (0,) * nd,
                            pipeline_mode=pl.Buffered(buffer_count=1))

    kernel = functools.partial(mixer_kernel, matmul_dtype=matmul_dtype,
                               approx_gelu=approx_gelu)

    return pl.pallas_call(
        kernel,
        out_shape=jax.ShapeDtypeStruct((B, P, D), x.dtype),
        grid_spec=pltpu.PrefetchScalarGridSpec(
            num_scalar_prefetch=0,
            grid=(B // bt,),
            in_specs=[
                pl.BlockSpec((bt, P, D), lambda i: (i, 0, 0)),  # x (batch block)
                const_spec((5, D)),        # packed LN params + fc4 bias
                const_spec((Hc + P, 1)),   # packed patch-mixer column biases
                const_spec((Hc, P)),       # fc1 W  (hidden_c, num_patches)
                const_spec((P, Hc)),       # fc2 W  (num_patches, hidden_c)
                const_spec((D, Hs)),       # fc3 W.T
                const_spec((1, Hs)),       # fc3 b
                const_spec((Hs, D)),       # fc4 W.T
            ],
            out_specs=pl.BlockSpec((bt, P, D), lambda i: (i, 0, 0)),
        ),
        compiler_params=pltpu.CompilerParams(
            dimension_semantics=("parallel",),
            # Conservative cap; fine for these shapes on v5e/v6e (128 MiB) and
            # v7x (64 MiB). Re-derive for production-sized weights.
            vmem_limit_bytes=32 * 1024 * 1024,
        ),
    )(x, dparams, cbias, w1, w2, w3t, b3, w4t)


def init_params(key, dim, num_patches, hidden_c, hidden_s):
    """Weights in natural PyTorch layout: W is (out_features, in_features)."""
    ks = jax.random.split(key, 8)
    u = lambda k, shape, fan_in: jax.random.uniform(
        k, shape, jnp.float32, -1.0 / jnp.sqrt(fan_in), 1.0 / jnp.sqrt(fan_in)
    )
    return {
        # MLPblock (patch mixing)
        "ln1_w": jnp.ones((dim,), jnp.float32),
        "ln1_b": jnp.zeros((dim,), jnp.float32),
        "w1": u(ks[0], (hidden_c, num_patches), num_patches),
        "b1": u(ks[1], (hidden_c,), num_patches),
        "w2": u(ks[2], (num_patches, hidden_c), hidden_c),
        "b2": u(ks[3], (num_patches,), hidden_c),
        # TokenMixer (channel mixing)
        "ln2_w": jnp.ones((dim,), jnp.float32),
        "ln2_b": jnp.zeros((dim,), jnp.float32),
        "w3": u(ks[4], (hidden_s, dim), dim),
        "b3": u(ks[5], (hidden_s,), dim),
        "w4": u(ks[6], (dim, hidden_s), hidden_s),
        "b4": u(ks[7], (dim,), hidden_s),
    }


def mixer_layer_ref(x, p):
    """Pure-JAX reference mirroring the PyTorch forward (for sanity checking)."""
    h = _layernorm(x, p["ln1_w"], p["ln1_b"])
    ht = jnp.swapaxes(h, 1, 2)                          # (B, D, P)
    a = _gelu_exact(ht @ p["w1"].T + p["b1"])           # (B, D, Hc)
    m = a @ p["w2"].T + p["b2"]                         # (B, D, P)
    y = x + jnp.swapaxes(m, 1, 2)                       # (B, P, D)
    h2 = _layernorm(y, p["ln2_w"], p["ln2_b"])
    a2 = _gelu_exact(h2 @ p["w3"].T + p["b3"])          # (B, P, Hs)
    return y + (a2 @ p["w4"].T + p["b4"])               # (B, P, D)


if __name__ == "__main__":
    # Small but lane-dense demo shapes: dim and hidden_s are 128-multiples so
    # input/output DMA rows and stores are full lane lines.
    B, P, D = 8, 8, 128           # batch, num_patches, dim
    hidden_c, hidden_s = 32, 128  # MLPblock hidden, TokenMixer hidden
    bt = 2                        # batch elements per grid step -> grid=(4,)

    key = jax.random.PRNGKey(0)
    kx, kp = jax.random.split(key)
    x = jax.random.normal(kx, (B, P, D), jnp.float32)
    params = init_params(kp, D, P, hidden_c, hidden_s)

    out = mixer_layer(x, params, bt=bt)
    out = jax.block_until_ready(out)

    ref = mixer_layer_ref(x, params)
    assert out.shape == (B, P, D)
    assert jnp.allclose(out, ref, atol=2e-4, rtol=2e-4), "mismatch vs reference"

    print("KERNEL_OK")
</pallas_src>

<mosaic_0001>
module attributes {stable_mosaic.version = 11 : i64} {
  func.func @mixer_kernel(%arg0: i32, %arg1: memref<2x8x128xf32, #tpu.memory_space<vmem>>, %arg2: memref<5x128xf32, #tpu.memory_space<vmem>>, %arg3: memref<40x1xf32, #tpu.memory_space<vmem>>, %arg4: memref<32x8xf32, #tpu.memory_space<vmem>>, %arg5: memref<8x32xf32, #tpu.memory_space<vmem>>, %arg6: memref<128x128xf32, #tpu.memory_space<vmem>>, %arg7: memref<1x128xf32, #tpu.memory_space<vmem>>, %arg8: memref<128x128xf32, #tpu.memory_space<vmem>>, %arg9: memref<2x8x128xf32, #tpu.memory_space<vmem>>) attributes {dimension_semantics = [#tpu.dimension_semantics<parallel>], iteration_bounds = array<i64: 4>, scalar_prefetch = 0 : i64, scratch_operands = 0 : i64, tpu.core_type = #tpu.core_type<tc>, window_params = [{transform_indices = @transform_0, window_bounds = array<i64: 2, 8, 128>}, {pipeline_mode = #tpu.pipeline_mode<synchronous>, transform_indices = @transform_1, window_bounds = array<i64: 5, 128>}, {pipeline_mode = #tpu.pipeline_mode<synchronous>, transform_indices = @transform_2, window_bounds = array<i64: 40, 1>}, {pipeline_mode = #tpu.pipeline_mode<synchronous>, transform_indices = @transform_3, window_bounds = array<i64: 32, 8>}, {pipeline_mode = #tpu.pipeline_mode<synchronous>, transform_indices = @transform_4, window_bounds = array<i64: 8, 32>}, {pipeline_mode = #tpu.pipeline_mode<synchronous>, transform_indices = @transform_5, window_bounds = array<i64: 128, 128>}, {pipeline_mode = #tpu.pipeline_mode<synchronous>, transform_indices = @transform_6, window_bounds = array<i64: 1, 128>}, {pipeline_mode = #tpu.pipeline_mode<synchronous>, transform_indices = @transform_7, window_bounds = array<i64: 128, 128>}, {transform_indices = @transform_8, window_bounds = array<i64: 2, 8, 128>}]} {
    %c0 = arith.constant 0 : index
    %c0_0 = arith.constant 0 : index
    %0 = vector.load %arg2[%c0, %c0_0] : memref<5x128xf32, #tpu.memory_space<vmem>>, vector<1x128xf32>
    %c1 = arith.constant 1 : index
    %c0_1 = arith.constant 0 : index
    %1 = vector.load %arg2[%c1, %c0_1] : memref<5x128xf32, #tpu.memory_space<vmem>>, vector<1x128xf32>
    %c2 = arith.constant 2 : index
    %c0_2 = arith.constant 0 : index
    %2 = vector.load %arg2[%c2, %c0_2] : memref<5x128xf32, #tpu.memory_space<vmem>>, vector<1x128xf32>
    %c3 = arith.constant 3 : index
    %c0_3 = arith.constant 0 : index
    %3 = vector.load %arg2[%c3, %c0_3] : memref<5x128xf32, #tpu.memory_space<vmem>>, vector<1x128xf32>
    %c4 = arith.constant 4 : index
    %c0_4 = arith.constant 0 : index
    %4 = vector.load %arg2[%c4, %c0_4] : memref<5x128xf32, #tpu.memory_space<vmem>>, vector<1x128xf32>
    %c0_5 = arith.constant 0 : index
    %c0_6 = arith.constant 0 : index
    %5 = vector.load %arg3[%c0_5, %c0_6] : memref<40x1xf32, #tpu.memory_space<vmem>>, vector<32x1xf32>
    %c32 = arith.constant 32 : index
    %c0_7 = arith.constant 0 : index
    %6 = vector.load %arg3[%c32, %c0_7] : memref<40x1xf32, #tpu.memory_space<vmem>>, vector<8x1xf32>
    %c0_8 = arith.constant 0 : index
    %c0_9 = arith.constant 0 : index
    %7 = vector.load %arg4[%c0_8, %c0_9] : memref<32x8xf32, #tpu.memory_space<vmem>>, vector<32x8xf32>
    %c0_10 = arith.constant 0 : index
    %c0_11 = arith.constant 0 : index
    %8 = vector.load %arg5[%c0_10, %c0_11] : memref<8x32xf32, #tpu.memory_space<vmem>>, vector<8x32xf32>
    %c0_12 = arith.constant 0 : index
    %c0_13 = arith.constant 0 : index
    %9 = vector.load %arg6[%c0_12, %c0_13] : memref<128x128xf32, #tpu.memory_space<vmem>>, vector<128x128xf32>
    %c0_14 = arith.constant 0 : index
    %c0_15 = arith.constant 0 : index
    %10 = vector.load %arg7[%c0_14, %c0_15] : memref<1x128xf32, #tpu.memory_space<vmem>>, vector<1x128xf32>
    %c0_16 = arith.constant 0 : index
    %c0_17 = arith.constant 0 : index
    %11 = vector.load %arg8[%c0_16, %c0_17] : memref<128x128xf32, #tpu.memory_space<vmem>>, vector<128x128xf32>
    %c0_18 = arith.constant 0 : index
    %c0_19 = arith.constant 0 : index
    %c0_20 = arith.constant 0 : index
    %12 = vector.load %arg1[%c0_18, %c0_19, %c0_20] : memref<2x8x128xf32, #tpu.memory_space<vmem>>, vector<1x8x128xf32>
    %13 = vector.shape_cast %12 : vector<1x8x128xf32> to vector<8x128xf32>
    %c1_21 = arith.constant 1 : index
    %c0_22 = arith.constant 0 : index
    %c0_23 = arith.constant 0 : index
    %14 = vector.load %arg1[%c1_21, %c0_22, %c0_23] : memref<2x8x128xf32, #tpu.memory_space<vmem>>, vector<1x8x128xf32>
    %15 = vector.shape_cast %14 : vector<1x8x128xf32> to vector<8x128xf32>
    %16 = tpu.concatenate %13, %15 in 0 : vector<8x128xf32>, vector<8x128xf32> -> vector<16x128xf32>
    %cst = arith.constant dense<0.000000e+00> : vector<16xf32>
    %17 = vector.multi_reduction <add>, %16, %cst [1] : vector<16x128xf32> to vector<16xf32>
    %18 = vector.shape_cast %17 : vector<16xf32> to vector<16x1xf32>
    %cst_24 = arith.constant 1.280000e+02 : f32
    %19 = vector.broadcast %cst_24 : f32 to vector<16x1xf32>
    %20 = arith.divf %18, %19 : vector<16x1xf32>
    %21 = vector.broadcast %20 : vector<16x1xf32> to vector<16x128xf32>
    %22 = arith.subf %16, %21 : vector<16x128xf32>
    %23 = arith.mulf %22, %22 : vector<16x128xf32>
    %cst_25 = arith.constant dense<0.000000e+00> : vector<16xf32>
    %24 = vector.multi_reduction <add>, %23, %cst_25 [1] : vector<16x128xf32> to vector<16xf32>
    %25 = vector.shape_cast %24 : vector<16xf32> to vector<16x1xf32>
    %cst_26 = arith.constant 1.280000e+02 : f32
    %26 = vector.broadcast %cst_26 : f32 to vector<16x1xf32>
    %27 = arith.divf %25, %26 : vector<16x1xf32>
    %28 = vector.broadcast %20 : vector<16x1xf32> to vector<16x128xf32>
    %29 = arith.subf %16, %28 : vector<16x128xf32>
    %cst_27 = arith.constant 9.99999974E-6 : f32
    %30 = vector.broadcast %cst_27 : f32 to vector<16x1xf32>
    %31 = arith.addf %27, %30 : vector<16x1xf32>
    %32 = math.rsqrt %31 : vector<16x1xf32>
    %33 = vector.broadcast %32 : vector<16x1xf32> to vector<16x128xf32>
    %34 = arith.mulf %29, %33 : vector<16x128xf32>
    %35 = vector.broadcast %0 : vector<1x128xf32> to vector<16x128xf32>
    %36 = arith.mulf %34, %35 : vector<16x128xf32>
    %37 = vector.broadcast %1 : vector<1x128xf32> to vector<16x128xf32>
    %38 = arith.addf %36, %37 : vector<16x128xf32>
    %39 = vector.extract_strided_slice %38 {offsets = [0, 0], sizes = [8, 128], strides = [1, 1]} : vector<16x128xf32> to vector<8x128xf32>
    %40 = vector.extract_strided_slice %38 {offsets = [8, 0], sizes = [8, 128], strides = [1, 1]} : vector<16x128xf32> to vector<8x128xf32>
    %41 = tpu.concatenate %39, %40 in 1 : vector<8x128xf32>, vector<8x128xf32> -> vector<8x256xf32>
    %cst_28 = arith.constant dense<0.000000e+00> : vector<32x256xf32>
    %42 = tpu.matmul %7, %41, %cst_28 {dimension_numbers = #tpu.dot_dimension_numbers<[1], [0], [0], [1], [0, 0, 1, 1], [], []>} : vector<32x8xf32>, vector<8x256xf32>, vector<32x256xf32> -> vector<32x256xf32>
    %43 = vector.broadcast %5 : vector<32x1xf32> to vector<32x256xf32>
    %44 = arith.addf %42, %43 : vector<32x256xf32>
    %cst_29 = arith.constant 5.000000e-01 : f32
    %45 = vector.broadcast %cst_29 : f32 to vector<32x256xf32>
    %46 = arith.mulf %45, %44 : vector<32x256xf32>
    %cst_30 = arith.constant 2.000000e+00 : f32
    %47 = math.sqrt %cst_30 : f32
    %cst_31 = arith.constant 1.000000e+00 : f32
    %48 = arith.divf %cst_31, %47 : f32
    %49 = vector.broadcast %48 : f32 to vector<32x256xf32>
    %50 = arith.mulf %44, %49 : vector<32x256xf32>
    %51 = math.erf %50 : vector<32x256xf32>
    %cst_32 = arith.constant 1.000000e+00 : f32
    %52 = vector.broadcast %cst_32 : f32 to vector<32x256xf32>
    %53 = arith.addf %52, %51 : vector<32x256xf32>
    %54 = arith.mulf %46, %53 : vector<32x256xf32>
    %cst_33 = arith.constant dense<0.000000e+00> : vector<8x256xf32>
    %55 = tpu.matmul %8, %54, %cst_33 {dimension_numbers = #tpu.dot_dimension_numbers<[1], [0], [0], [1], [0, 0, 1, 1], [], []>} : vector<8x32xf32>, vector<32x256xf32>, vector<8x256xf32> -> vector<8x256xf32>
    %56 = vector.broadcast %6 : vector<8x1xf32> to vector<8x256xf32>
    %57 = arith.addf %55, %56 : vector<8x256xf32>
    %58 = vector.extract_strided_slice %57 {offsets = [0, 0], sizes = [8, 128], strides = [1, 1]} : vector<8x256xf32> to vector<8x128xf32>
    %59 = vector.extract_strided_slice %57 {offsets = [0, 128], sizes = [8, 128], strides = [1, 1]} : vector<8x256xf32> to vector<8x128xf32>
    %60 = tpu.concatenate %58, %59 in 0 : vector<8x128xf32>, vector<8x128xf32> -> vector<16x128xf32>
    %61 = arith.addf %16, %60 : vector<16x128xf32>
    %cst_34 = arith.constant dense<0.000000e+00> : vector<16xf32>
    %62 = vector.multi_reduction <add>, %61, %cst_34 [1] : vector<16x128xf32> to vector<16xf32>
    %63 = vector.shape_cast %62 : vector<16xf32> to vector<16x1xf32>
    %cst_35 = arith.constant 1.280000e+02 : f32
    %64 = vector.broadcast %cst_35 : f32 to vector<16x1xf32>
    %65 = arith.divf %63, %64 : vector<16x1xf32>
    %66 = vector.broadcast %65 : vector<16x1xf32> to vector<16x128xf32>
    %67 = arith.subf %61, %66 : vector<16x128xf32>
    %68 = arith.mulf %67, %67 : vector<16x128xf32>
    %cst_36 = arith.constant dense<0.000000e+00> : vector<16xf32>
    %69 = vector.multi_reduction <add>, %68, %cst_36 [1] : vector<16x128xf32> to vector<16xf32>
    %70 = vector.shape_cast %69 : vector<16xf32> to vector<16x1xf32>
    %cst_37 = arith.constant 1.280000e+02 : f32
    %71 = vector.broadcast %cst_37 : f32 to vector<16x1xf32>
    %72 = arith.divf %70, %71 : vector<16x1xf32>
    %73 = vector.broadcast %65 : vector<16x1xf32> to vector<16x128xf32>
    %74 = arith.subf %61, %73 : vector<16x128xf32>
    %cst_38 = arith.constant 9.99999974E-6 : f32
    %75 = vector.broadcast %cst_38 : f32 to vector<16x1xf32>
    %76 = arith.addf %72, %75 : vector<16x1xf32>
    %77 = math.rsqrt %76 : vector<16x1xf32>
    %78 = vector.broadcast %77 : vector<16x1xf32> to vector<16x128xf32>
    %79 = arith.mulf %74, %78 : vector<16x128xf32>
    %80 = vector.broadcast %2 : vector<1x128xf32> to vector<16x128xf32>
    %81 = arith.mulf %79, %80 : vector<16x128xf32>
    %82 = vector.broadcast %3 : vector<1x128xf32> to vector<16x128xf32>
    %83 = arith.addf %81, %82 : vector<16x128xf32>
    %cst_39 = arith.constant dense<0.000000e+00> : vector<16x128xf32>
    %84 = tpu.matmul %83, %9, %cst_39 {dimension_numbers = #tpu.dot_dimension_numbers<[1], [0], [0], [1], [0, 0, 1, 1], [], []>} : vector<16x128xf32>, vector<128x128xf32>, vector<16x128xf32> -> vector<16x128xf32>
    %85 = vector.broadcast %10 : vector<1x128xf32> to vector<16x128xf32>
    %86 = arith.addf %84, %85 : vector<16x128xf32>
    %cst_40 = arith.constant 5.000000e-01 : f32
    %87 = vector.broadcast %cst_40 : f32 to vector<16x128xf32>
    %88 = arith.mulf %87, %86 : vector<16x128xf32>
    %cst_41 = arith.constant 2.000000e+00 : f32
    %89 = math.sqrt %cst_41 : f32
    %cst_42 = arith.constant 1.000000e+00 : f32
    %90 = arith.divf %cst_42, %89 : f32
    %91 = vector.broadcast %90 : f32 to vector<16x128xf32>
    %92 = arith.mulf %86, %91 : vector<16x128xf32>
    %93 = math.erf %92 : vector<16x128xf32>
    %cst_43 = arith.constant 1.000000e+00 : f32
    %94 = vector.broadcast %cst_43 : f32 to vector<16x128xf32>
    %95 = arith.addf %94, %93 : vector<16x128xf32>
    %96 = arith.mulf %88, %95 : vector<16x128xf32>
    %cst_44 = arith.constant dense<0.000000e+00> : vector<16x128xf32>
    %97 = tpu.matmul %96, %11, %cst_44 {dimension_numbers = #tpu.dot_dimension_numbers<[1], [0], [0], [1], [0, 0, 1, 1], [], []>} : vector<16x128xf32>, vector<128x128xf32>, vector<16x128xf32> -> vector<16x128xf32>
    %98 = arith.addf %61, %97 : vector<16x128xf32>
    %99 = vector.broadcast %4 : vector<1x128xf32> to vector<16x128xf32>
    %100 = arith.addf %98, %99 : vector<16x128xf32>
    %101 = vector.extract_strided_slice %100 {offsets = [0, 0], sizes = [8, 128], strides = [1, 1]} : vector<16x128xf32> to vector<8x128xf32>
    %c0_45 = arith.constant 0 : index
    %c0_46 = arith.constant 0 : index
    %c0_47 = arith.constant 0 : index
    %102 = vector.load %arg9[%c0_45, %c0_46, %c0_47] : memref<2x8x128xf32, #tpu.memory_space<vmem>>, vector<1x8x128xf32>
    %103 = vector.shape_cast %102 : vector<1x8x128xf32> to vector<8x128xf32>
    %104 = vector.shape_cast %101 : vector<8x128xf32> to vector<1x8x128xf32>
    tpu.vector_store %arg9[%c0_45, %c0_46, %c0_47], %104 {strides = array<i32>} : memref<2x8x128xf32, #tpu.memory_space<vmem>>, vector<1x8x128xf32>,
    %105 = vector.extract_strided_slice %100 {offsets = [8, 0], sizes = [8, 128], strides = [1, 1]} : vector<16x128xf32> to vector<8x128xf32>
    %c1_48 = arith.constant 1 : index
    %c0_49 = arith.constant 0 : index
    %c0_50 = arith.constant 0 : index
    %106 = vector.load %arg9[%c1_48, %c0_49, %c0_50] : memref<2x8x128xf32, #tpu.memory_space<vmem>>, vector<1x8x128xf32>
    %107 = vector.shape_cast %106 : vector<1x8x128xf32> to vector<8x128xf32>
    %108 = vector.shape_cast %105 : vector<8x128xf32> to vector<1x8x128xf32>
    tpu.vector_store %arg9[%c1_48, %c0_49, %c0_50], %108 {strides = array<i32>} : memref<2x8x128xf32, #tpu.memory_space<vmem>>, vector<1x8x128xf32>,
    return
  }
  func.func @transform_0(%arg0: i32) -> (i32, i32, i32) {
    %c0_i32 = arith.constant 0 : i32
    %c0_i32_0 = arith.constant 0 : i32
    %c0_i32_1 = arith.constant 0 : i32
    return %arg0, %c0_i32, %c0_i32_0 : i32, i32, i32
  }
  func.func @transform_1(%arg0: i32) -> (i32, i32) {
    %c0_i32 = arith.constant 0 : i32
    %c0_i32_0 = arith.constant 0 : i32
    %c0_i32_1 = arith.constant 0 : i32
    return %c0_i32, %c0_i32_0 : i32, i32
  }
  func.func @transform_2(%arg0: i32) -> (i32, i32) {
    %c0_i32 = arith.constant 0 : i32
    %c0_i32_0 = arith.constant 0 : i32
    %c0_i32_1 = arith.constant 0 : i32
    return %c0_i32, %c0_i32_0 : i32, i32
  }
  func.func @transform_3(%arg0: i32) -> (i32, i32) {
    %c0_i32 = arith.constant 0 : i32
    %c0_i32_0 = arith.constant 0 : i32
    %c0_i32_1 = arith.constant 0 : i32
    return %c0_i32, %c0_i32_0 : i32, i32
  }
  func.func @transform_4(%arg0: i32) -> (i32, i32) {
    %c0_i32 = arith.constant 0 : i32
    %c0_i32_0 = arith.constant 0 : i32
    %c0_i32_1 = arith.constant 0 : i32
    return %c0_i32, %c0_i32_0 : i32, i32
  }
  func.func @transform_5(%arg0: i32) -> (i32, i32) {
    %c0_i32 = arith.constant 0 : i32
    %c0_i32_0 = arith.constant 0 : i32
    %c0_i32_1 = arith.constant 0 : i32
    return %c0_i32, %c0_i32_0 : i32, i32
  }
  func.func @transform_6(%arg0: i32) -> (i32, i32) {
    %c0_i32 = arith.constant 0 : i32
    %c0_i32_0 = arith.constant 0 : i32
    %c0_i32_1 = arith.constant 0 : i32
    return %c0_i32, %c0_i32_0 : i32, i32
  }
  func.func @transform_7(%arg0: i32) -> (i32, i32) {
    %c0_i32 = arith.constant 0 : i32
    %c0_i32_0 = arith.constant 0 : i32
    %c0_i32_1 = arith.constant 0 : i32
    return %c0_i32, %c0_i32_0 : i32, i32
  }
  func.func @transform_8(%arg0: i32) -> (i32, i32, i32) {
    %c0_i32 = arith.constant 0 : i32
    %c0_i32_0 = arith.constant 0 : i32
    %c0_i32_1 = arith.constant 0 : i32
    return %arg0, %c0_i32, %c0_i32_0 : i32, i32, i32
  }
}

</mosaic_0001>

<bundles_post_ra>
// kernel: tpu_custom_call.1
= control target key start
LH: loop header
LB: loop body
LE: loop exit
PB: predicated region body
PF: predicated region fallthrough
CT: control target
= control target key end

     0   :  { %13 = vsyncpa [#allocation3], 0  ;;  %s1709_s0 = inlined_call_operand.vmem [shape: f32[8,8,128], index: 0, kind: input, shape index: {}]   ;;  %s1710_s1 = inlined_call_operand.vmem [shape: f32[5,128], index: 1, kind: input, shape index: {}]   ;;  %s1711_s2 = inlined_call_operand.vmem [shape: f32[40,1], index: 2, kind: input, shape index: {}]   ;;  %s1712_s3 = inlined_call_operand.vmem [shape: f32[32,8], index: 3, kind: input, shape index: {}]   ;;  %s1713_s4 = inlined_call_operand.vmem [shape: f32[8,32], index: 4, kind: input, shape index: {}]   ;;  %s1714_s5 = inlined_call_operand.hbm [shape: f32[128,128], index: 5, kind: input, shape index: {}]   ;;  %s1715_s6 = inlined_call_operand.vmem [shape: f32[1,128], index: 6, kind: input, shape index: {}]   ;;  %s1716_s7 = inlined_call_operand.hbm [shape: f32[128,128], index: 7, kind: input, shape index: {}]   ;;  %s1717_s8 = inlined_call_operand.hbm [shape: f32[8,8,128], index: 8, kind: output, shape index: {}]  }
   0x1   :  { %14 = vsyncpa [#allocation6], 0 }
   0x2   :  { %15 = vsyncpa [#allocation4], 0 }
   0x3   :  { %17 = vsyncpa [#allocation4 + $0x1], 0  ;;  %s1462_s27 = smov 0   ;;  %s1464_s28 = smov 0  }
   0x4   :  { %s1466_s29 = smov 0   ;;  %s1468_s30 = smov 0  }
   0x5 LB: > { %1722 = sst [smem:[#allocation11_spill]] %s1402_s29  ;;  %s1483_s9 = sadd.s32 4294967295, %s1406_s30   ;;  %s1406_s30 = sphi %s1468_s30, %s1739_s30   ;;  %s1402_s29 = sphi %s1466_s29, %s1736_s29   ;;  %s1398_s28 = sphi %s1464_s28, %s1738_s28   ;;  %s1394_s27 = sphi %s1462_s27, %s1737_s27  }
   0x6   : > { %s976_s10 = sadd.s32 4294967294, %s1406_s30   ;;  %s1487_s11 = sadd.s32 1, %s1406_s30  }
   0x7   : > { %s203_s12 = sadd.s32 1, %s1402_s29  ;;  %s200_s13 = ssub.s32 %s1406_s30, %s1487_s11 }
   0x8   : > { %p213_p0 = scmp.ne.s32.totalorder %s1402_s29, %s1398_s28  ;;  %p201_p1 = scmp.eq.s32.totalorder %s200_s13, 0 }
   0x9   : > { %p214_p2 = scmp.eq.s32.totalorder %s1483_s9, 3  ;;  %p219_p3 = scmp.ne.s32.totalorder %s1398_s28, %s1394_s27 }
   0xa   : > { %p220_p4 = scmp.eq.s32.totalorder %s976_s10, 3  ;;  %p977_p7 = scmp.ge.s32.totalorder %s1406_s30, 1 }
   0xb   : > { %s1498_s14 = scalar_select %p201_p1, %s1402_s29, %s203_s12  }
   0xc   : > { %p1500_p5 = por %p214_p2, %p213_p0  ;;  %p1504_p6 = por %p220_p4, %p219_p3 }
   0xd   : > { %1723 = sst [smem:[#allocation12_spill]] %s1498_s14  ;;  %p227_p8 = scmp.lt.s32.totalorder %s1406_s30, 5 }
   0xe   : > { %s1724_s15 = scalar_select %p1500_p5, 1, 0 }
   0xf   : > { %s1725_s16 = scalar_select %p1504_p6, 1, 0 }
  0x10   : > { %p1718_p9 = scmp.eq.s32.totalorder %s1483_s9, 0  ;;  %p1511_p10 = pnand %p977_p7, %p227_p8 }
  0x11   : > { %s1408_s18 = smov [#allocation2]   ;;  %s1409_s21 = smov [#allocation5]  }
  0x12   : > { %s1726_s17 = scalar_select %p1511_p10, 1, 0 }
  0x13   : > { %s251_s19 = sshll.u32 %s1408_s18, 4  ;;  %p1194_p11 = pneg %p1511_p10  ;;  %s252_s19 = int_to_ptr.vmem [resolvable:$true] %s251_s19 }
  0x14   : > { %s267_s22 = sshll.u32 %s1409_s21, 4  ;;  %s1280_s25 = scalar_lea.hbm %s1714_s5, 2048  ;;  %s1523_s22 = int_to_ptr.vmem [resolvable:$true] %s267_s22 }
  0x15   : > { %p1519_p12 = pnand %p1718_p9, %p1194_p11  ;;  %p1281_p13 = scmp.ne.s32.totalorder %s1714_s5, %s1280_s25 }
  0x16   : > { %p1287_p3 = scmp.lt.u32.totalorder %s1280_s25, %s1714_s5 }
  0x17   : > { %p1282_p0 = pneg %p1519_p12 }
  0x19   : > { %p1283_p1 = pnand %p1282_p0, %p1281_p13 }
  0x1b   : > { %p1284_p2 = pneg %p1283_p1 }
  0x1d   : > { %p1289_p4 = pnand %p1287_p3, %p1284_p2 }
  0x1f   : > { %1292 = shalt.err (!%p1289_p4)
}
  0x20   : > { %s1293_s18 = scalar_lea.vmem %s252_s19, 2048  ;;  %p1301_p9 = scmp.lt.s32.totalorder %s252_s19, %s252_s19 }
  0x21   : > { %p1294_p7 = scmp.ne.s32.totalorder %s252_s19, %s1293_s18  ;;  %p1302_p6 = scmp.lt.s32.totalorder %s1293_s18, %s1293_s18 }
  0x23   : > { %p1296_p8 = pnand %p1294_p7, %p1282_p0  ;;  %p1303_p5 = por %p1302_p6, %p1301_p9 }
  0x25   : > { %p1297_p11 = pneg %p1296_p8 }
  0x27   : > { %p1304_p10 = pnand %p1303_p5, %p1297_p11 }
  0x29   : > { %1307 = shalt.err (!%p1304_p10)
}
  0x2a   : > { %s1410_s21 = smov 128   ;;  %s1411_s23 = smov 8  }
  0x2b   : > { %1197 = dma.hbm_to_vmem [thread:$0]  (!%p1519_p12), %s1714_s5, 2048, %s252_s19, [#allocation3], %s1410_s21, %s1410_s21, %s1411_s23  }
  0x2c   : > { %s1308_s12 = scalar_lea.hbm %s1716_s7, 2048 }
  0x2d   : > { %p1309_p13 = scmp.ne.s32.totalorder %s1716_s7, %s1308_s12  ;;  %p1315_p9 = scmp.lt.u32.totalorder %s1308_s12, %s1716_s7 }
  0x2f   : > { %p1311_p5 = pnand %p1309_p13, %p1282_p0 }
  0x31   : > { %p1312_p6 = pneg %p1311_p5 }
  0x33   : > { %p1317_p10 = pnand %p1315_p9, %p1312_p6 }
  0x35   : > { %1320 = shalt.err (!%p1317_p10)
}
  0x36   : > { %s1321_s19 = scalar_lea.vmem %s1523_s22, 2048  ;;  %p1329_p4 = scmp.lt.s32.totalorder %s1523_s22, %s1523_s22 }
  0x37   : > { %p1322_p1 = scmp.ne.s32.totalorder %s1523_s22, %s1321_s19  ;;  %p1330_p7 = scmp.lt.s32.totalorder %s1321_s19, %s1321_s19 }
  0x39   : > { %p1324_p2 = pnand %p1322_p1, %p1282_p0  ;;  %p1331_p8 = por %p1330_p7, %p1329_p4 }
  0x3b   : > { %p1325_p3 = pneg %p1324_p2 }
  0x3d   : > { %p1332_p11 = pnand %p1331_p8, %p1325_p3 }
  0x3f   : > { %1335 = shalt.err (!%p1332_p11)
}
  0x40   : > { %1200 = dma.hbm_to_vmem [thread:$0]  (!%p1519_p12), %s1716_s7, 2048, %s1523_s22, [#allocation6], %s1410_s21, %s1410_s21, %s1411_s23  }
  0x41   : > { %p1728_p13 = scmp.ne.s32.totalorder %s1726_s17, 0 }
  0x42   : > { %p1729_p5 = scmp.eq.s32.totalorder (!%p1728_p13), %s1483_s9, 0 }
  0x43   : > { %292 = sbr.rel (%p1728_p13) target bundleno = 1648 (0x670), region = 52 }
  0x4a   : > { %1381 = dma.done.wait (%p1729_p5), [#allocation3], 2048   ;;  %p1730_p0 = pmov %p1729_p5 }
  0x4c   : > { %1383 = vsyncadd (%p1730_p0), [#allocation3], 4294965248  ;;  %p1731_p6 = pmov %p1730_p0 }
  0x4d   : > { %p1732_p9 = pmov %p1730_p0 }
  0x4e   : > { %1385 = dma.done.wait (%p1731_p6), [#allocation6], 2048  }
  0x4f   : > { %1387 = vsyncadd (%p1732_p9), [#allocation6], 4294965248  ;;  %s985_s20 = sshll.u32 %s1483_s9, 1  ;;  %v1412_v10 = vmov 0.0   ;;  %v343_v11 = vld [vmem:[%s1711_s2 + $0x8] sm:$0xff]  ;;  %v342_v12 = vld [vmem:[%s1711_s2] sm:$0xff] }
  0x50   : > { %p331_p10 = scmp.lt.s32.totalorder %s985_s20, 7  ;;  %520 = vmatprep.mubr.f32.mxu0 %v1412_v10  ;;  %658 = vmatprep.mubr.f32.mxu1 %v1412_v10  ;;  %v1413_v13 = vmov 0   ;;  %v344_v14 = vld [vmem:[%s1711_s2 + $0x10] sm:$0xff]  ;;  %v345_v15 = vld [vmem:[%s1711_s2 + $0x18] sm:$0xff]  ;;  %v346_v16 = vld [vmem:[%s1711_s2 + $0x20] sm:$0xff]  ;;  %vm443_vm0 = vcmask 64512  }
  0x51   : > { %1251 = vset.pattern.permute.xlu1 %v1413_v13  ;;  %1250 = vset.pattern.permute.xlu0 %v1413_v13  ;;  %v988_v24 = vld [vmem:[%s1710_s1] ss:$0 sm:$0xff]  ;;  %v989_v26 = vld [vmem:[%s1710_s1 + $0x1] ss:$0 sm:$0xff]  ;;  %v348_v34 = vld [vmem:[%s1712_s3 + $0x8] sm:$0xff]  ;;  %vm590_vm1 = vcmask 261120  }
  0x52   : > { %s1741_s20 = smov (!%p331_p10, %s985_s20), 7  ;;  %v347_v33 = vld [vmem:[%s1712_s3] sm:$0xff]  ;;  %v349_v35 = vld [vmem:[%s1712_s3 + $0x10] sm:$0xff]  ;;  %v350_v36 = vld [vmem:[%s1712_s3 + $0x18] sm:$0xff]  ;;  %s327_s24 = sand.u32 1, %s1398_s28  }
  0x53   : > { %s986_s22 = sshll.u32 %s1741_s20, 3  ;;  %s984_s25 = sshll.u32 %s327_s24, 4 }
  0x54   : > { %s334_s23 = scalar_lea.vmem %s1709_s0, %s986_s22  ;;  %s329_s12 = scalar_lea.vmem [#allocation7], %s984_s25 }
  0x55   : > { %v1586_v0 = vld [vmem:[%s334_s23 + $0x8] sm:$0xff]  ;;  %v1589_v1 = vld [vmem:[%s334_s23] sm:$0xff]  ;;  %s892_s13 = sshll.u32 %s329_s12, 4  ;;  %s1005_s18 = sshll.u32 %s1483_s9, 8  ;;  %s1661_s13 = int_to_ptr.vmem [resolvable:$true] %s892_s13 }
  0x56   : > { %390 = vadd.xlane.f32.xlu0 %v1586_v0  ;;  %s1666_s14 = scalar_lea.hbm %s1717_s8, %s1005_s18  ;;  %s1668_s9 = scalar_lea.sflag [#allocation4], %s327_s24 }
  0x57   : > { %s1336_s20 = scalar_lea.vmem %s1661_s13, 256  ;;  %p1733_p1 = scmp.ne.s32.totalorder %s1724_s15, 0 }
  0x58   : > { %p1337_p12 = scmp.ne.s32.totalorder %s1661_s13, %s1336_s20  ;;  %s1414_s22 = smov [#allocation7]  }
  0x59   : > { %s1340_s21 = sshll.u32 %s1414_s22, 4  ;;  %s1341_s21 = int_to_ptr.vmem [resolvable:$false] %s1340_s21 }
  0x5a   : > { %388 = vadd.xlane.f32.xlu0 %v1589_v1  ;;  %p1338_p2 = pnand %p1337_p12, %p1733_p1  ;;  %s1342_s17 = scalar_lea.vmem %s1341_s21, 512 }
  0x5b   : > { %p1343_p4 = scmp.lt.s32.totalorder %s1661_s13, %s1341_s21  ;;  %p1344_p7 = scmp.lt.s32.totalorder %s1342_s17, %s1336_s20 }
  0x5c   : > { %p1339_p3 = pneg %p1338_p2 }
  0x5d   : > { %p1345_p8 = por %p1344_p7, %p1343_p4 }
  0x5f   : > { %p1346_p11 = pnand %p1345_p8, %p1339_p3 }
  0x70   : > { %425 = vperm.xlu0 %1250, %v342_v12  }
  0xe3   : > { %v391_v2 = vpop.xlane.xlu0 %390 }
  0xe4   : > { %v394_v3 = vmul.f32 0.0078125, %v391_v2 }
  0xe6   : > { %v396_v4 = vsub.f32 %v1586_v0, %v394_v3 }
  0xe7   : > { %v389_v5 = vpop.xlane.xlu0 %388 }
  0xe8   : > { %v393_v6 = vmul.f32 0.0078125, %v389_v5  ;;  %v398_v7 = vmul.f32 %v396_v4, %v396_v4 }
  0xea   : > { %v395_v8 = vsub.f32 %v1589_v1, %v393_v6  ;;  %401 = vadd.xlane.f32.xlu1 %v398_v7 }
  0xec   : > { %v397_v9 = vmul.f32 %v395_v8, %v395_v8 }
  0xee   : > { %399 = vadd.xlane.f32.xlu1 %v397_v9 }
  0xef   : > { %v426_v37 = vpop.permute.xlu0 %425 }
  0xff   : > { %430 = vperm.xlu1 %1251, %v343_v11  }
 0x103   : > { %435 = vperm.xlu1 %1251, %v344_v14  }
 0x107   : > { %440 = vperm.xlu1 %1251, %v345_v15  }
 0x10b   : > { %587 = vperm.xlu1 %1251, %v346_v16  }
 0x177   : > { %v402_v17 = vpop.xlane.xlu1 %401 }
 0x178   : > { %v404_v18 = vmul.f32 0.0078125, %v402_v17 }
 0x17a   : > { %v406_v19 = vadd.f32 1e-05, %v404_v18 }
 0x17b   : > { %v400_v20 = vpop.xlane.xlu1 %399 }
 0x17c   : > { %1252 = vrsqrt.f32 %v406_v19  ;;  %v403_v21 = vmul.f32 0.0078125, %v400_v20 }
 0x17e   : > { %v405_v22 = vadd.f32 1e-05, %v403_v21 }
 0x17f   : > { %v431_v38 = vpop.permute.xlu1 %430 }
 0x180   : > { %1254 = vrsqrt.f32 %v405_v22 }
 0x183   : > { %v436_v48 = vpop.permute.xlu1 %435 }
 0x186   : > { %v1253_v23 = vpop.eup %1252 }
 0x187   : > { %v410_v25 = vmul.f32 %v1253_v23, %v396_v4  ;;  %v441_v57 = vpop.permute.xlu1 %440 }
 0x189   : > { %v416_v27 = vmul.f32 %v988_v24, %v410_v25 }
 0x18a   : > { %v1255_v28 = vpop.eup %1254 }
 0x18b   : > { %v422_v29 = vadd.f32 %v989_v26, %v416_v27  ;;  %v409_v30 = vmul.f32 %v1255_v28, %v395_v8 }
 0x18d   : > { %456 = vmatprep.subr.mxu0 %v422_v29  ;;  %v415_v31 = vmul.f32 %v988_v24, %v409_v30 }
 0x18f   : > { %v421_v32 = vadd.f32 %v989_v26, %v415_v31 }
 0x191   : > { %457 = vmatpush1.msra.mxu0 %v421_v32 }
 0x192   : > { %990 = vmatmul.mubr.msk.f32.vlgmr.msra.gmra.mrb[0].mxu0 %vm443_vm0, %v347_v33 }
 0x193   : > { %526 = vmatprep.mubr.f32.mxu0 %v1412_v10 }
 0x196   : > { %991 = vmatmul.mubr.msk.f32.gmra.mrb[2].mxu0 %vm443_vm0, %v348_v34 }
 0x197   : > { %532 = vmatprep.mubr.f32.mxu0 %v1412_v10 }
 0x19a   : > { %992 = vmatmul.mubr.msk.f32.gmra.mrb[4].mxu0 %vm443_vm0, %v349_v35 }
 0x19b   : > { %538 = vmatprep.mubr.f32.mxu0 %v1412_v10 }
 0x19e   : > { %993 = vmatmul.mubr.msk.f32.gmra.mrb[6].mxu0 %vm443_vm0, %v350_v36 }
 0x265   : > { %v522_v39 = vpop.f32.mrb[0].mxu0 }
 0x266   : > { %v523_v40 = vadd.f32 %v522_v39, %v426_v37  ;;  %v524_v41 = vpop.f32.mrb[1].mxu0  ;;  %v351_v39 = vld [vmem:[%s1713_s4] sm:$0xff] }
 0x267   : > { %v525_v42 = vadd.f32 %v524_v41, %v426_v37 }
 0x268   : > { %v553_v43 = vmul.f32 0.70710677, %v523_v40  ;;  %v545_v9 = vmul.f32 0.5, %v523_v40  ;;  %v588_v40 = vpop.permute.xlu1 %587 }
 0x269   : > { %v554_v44 = vmul.f32 0.70710677, %v525_v42  ;;  %v528_v45 = vpop.f32.mrb[2].mxu0  ;;  %v546_v12 = vmul.f32 0.5, %v525_v42 }
 0x26a   : > { %1256 = verf.f32 %v553_v43  ;;  %v529_v46 = vadd.f32 %v528_v45, %v431_v38  ;;  %v530_v47 = vpop.f32.mrb[3].mxu0 }
 0x26b   : > { %1258 = verf.f32 %v554_v44  ;;  %v531_v49 = vadd.f32 %v530_v47, %v431_v38  ;;  %v352_v47 = vld [vmem:[#allocation2] sm:$0xff] }
 0x26c   : > { %v555_v50 = vmul.f32 0.70710677, %v529_v46  ;;  %v547_v10 = vmul.f32 0.5, %v529_v46 }
 0x26d   : > { %v556_v51 = vmul.f32 0.70710677, %v531_v49  ;;  %v534_v52 = vpop.f32.mrb[4].mxu0  ;;  %v548_v13 = vmul.f32 0.5, %v531_v49  ;;  %v354_v49 = vld [vmem:[#allocation2 + $0x10] sm:$0xff] }
 0x26e   : > { %1260 = verf.f32 %v555_v50  ;;  %v535_v53 = vadd.f32 %v534_v52, %v436_v48  ;;  %v536_v54 = vpop.f32.mrb[5].mxu0 }
 0x26f   : > { %1262 = verf.f32 %v556_v51  ;;  %v537_v55 = vadd.f32 %v536_v54, %v436_v48  ;;  %v353_v48 = vld [vmem:[#allocation2 + $0x8] sm:$0xff]  ;;  %v355_v51 = vld [vmem:[#allocation2 + $0x18] sm:$0xff] }
 0x270   : > { %v557_v56 = vmul.f32 0.70710677, %v535_v53  ;;  %v549_v27 = vmul.f32 0.5, %v535_v53  ;;  %v1120_v50 = vpack.c.bf16 %v353_v48, %v352_v47  ;;  %v1124_v52 = vpack.c.bf16 %v355_v51, %v354_v49  ;;  %v379_v48 = vld [vmem:[#allocation5 + $0x50] sm:$0xff]  ;;  %v380_v49 = vld [vmem:[#allocation5 + $0x58] sm:$0xff]  ;;  %v381_v51 = vld [vmem:[#allocation5 + $0x60] sm:$0xff] }
 0x271   : > { %v558_v58 = vmul.f32 0.70710677, %v537_v55  ;;  %v540_v59 = vpop.f32.mrb[6].mxu0  ;;  %v550_v30 = vmul.f32 0.5, %v537_v55 }
 0x272   : > { %1264 = verf.f32 %v557_v56  ;;  %v541_v60 = vadd.f32 %v540_v59, %v441_v57  ;;  %v542_v61 = vpop.f32.mrb[7].mxu0  ;;  %1121 = vmatprep.subr.bf16.mxu0 %v1120_v50  ;;  %v356_v59 = vld [vmem:[#allocation2 + $0x20] sm:$0xff] }
 0x273   : > { %1266 = verf.f32 %v558_v58  ;;  %v543_v62 = vadd.f32 %v542_v61, %v441_v57  ;;  %1123 = vmatpush3.bf16.msra.mxu0 %v1120_v50  ;;  %v1172_v50 = vpack.c.bf16 %v380_v49, %v379_v48 }
 0x274   : > { %v1257_v63 = vpop.eup %1256  ;;  %v559_v2 = vmul.f32 0.70710677, %v541_v60  ;;  %v551_v28 = vmul.f32 0.5, %v541_v60  ;;  %1125 = vmatprep.subr.bf16.mxu0 %v1124_v52  ;;  %v357_v60 = vld [vmem:[#allocation2 + $0x28] sm:$0xff] }
 0x275   : > { %v1259_v3 = vpop.eup %1258  ;;  %v560_v4 = vmul.f32 0.70710677, %v543_v62  ;;  %v569_v5 = vadd.f32 1.0, %v1257_v63  ;;  %v552_v31 = vmul.f32 0.5, %v543_v62  ;;  %v1128_v61 = vpack.c.bf16 %v357_v60, %v356_v59  ;;  %v358_v62 = vld [vmem:[#allocation2 + $0x30] sm:$0xff]  ;;  %v359_v63 = vld [vmem:[#allocation2 + $0x38] sm:$0xff] }
 0x276   : > { %1268 = verf.f32 %v559_v2  ;;  %v570_v7 = vadd.f32 1.0, %v1259_v3  ;;  %v1132_v2 = vpack.c.bf16 %v359_v63, %v358_v62  ;;  %v360_v3 = vld [vmem:[#allocation2 + $0x40] sm:$0xff] }
 0x277   : > { %1270 = verf.f32 %v560_v4  ;;  %v577_v15 = vmul.f32 %v569_v5, %v545_v9  ;;  %1127 = vmatpush3.bf16.msra.mxu0 %v1124_v52  ;;  %v361_v4 = vld [vmem:[#allocation2 + $0x48] sm:$0xff] }
 0x278   : > { %v1261_v6 = vpop.eup %1260  ;;  %v578_v18 = vmul.f32 %v570_v7, %v546_v12  ;;  %1129 = vmatprep.subr.bf16.mxu0 %v1128_v61  ;;  %v1136_v5 = vpack.c.bf16 %v361_v4, %v360_v3  ;;  %v363_v7 = vld [vmem:[#allocation2 + $0x58] sm:$0xff]  ;;  %v366_v12 = vld [vmem:[#allocation2 + $0x70] sm:$0xff]  ;;  %v382_v52 = vld [vmem:[#allocation5 + $0x68] sm:$0xff] }
 0x279   : > { %v1263_v8 = vpop.eup %1262  ;;  %v571_v11 = vadd.f32 1.0, %v1261_v6  ;;  %v362_v6 = vld [vmem:[#allocation2 + $0x50] sm:$0xff] }
 0x27a   : > { %v572_v14 = vadd.f32 1.0, %v1263_v8  ;;  %v364_v8 = vld [vmem:[#allocation2 + $0x60] sm:$0xff]  ;;  %v1140_v9 = vpack.c.bf16 %v363_v7, %v362_v6 }
 0x27b   : > { %v579_v16 = vmul.f32 %v571_v11, %v547_v10  ;;  %1131 = vmatpush3.bf16.msra.mxu0 %v1128_v61  ;;  %v365_v10 = vld [vmem:[#allocation2 + $0x68] sm:$0xff] }
 0x27c   : > { %v1265_v17 = vpop.eup %1264  ;;  %v580_v19 = vmul.f32 %v572_v14, %v548_v13  ;;  %1133 = vmatprep.subr.bf16.mxu0 %v1132_v2  ;;  %v1144_v11 = vpack.c.bf16 %v365_v10, %v364_v8  ;;  %v367_v13 = vld [vmem:[#allocation2 + $0x78] sm:$0xff]  ;;  %v998_v8 = vld [vmem:[%s1710_s1 + $0x4] ss:$0 sm:$0xff] }
 0x27d   : > { %v1267_v20 = vpop.eup %1266  ;;  %v1114_v21 = vpack.c.bf16 %v579_v16, %v577_v15  ;;  %v573_v23 = vadd.f32 1.0, %v1265_v17  ;;  %v1148_v14 = vpack.c.bf16 %v367_v13, %v366_v12  ;;  %v369_v15 = vld [vmem:[#allocation5] sm:$0xff]  ;;  %v370_v16 = vld [vmem:[#allocation5 + $0x8] sm:$0xff]  ;;  %v371_v17 = vld [vmem:[#allocation5 + $0x10] sm:$0xff] }
 0x27e   : > { %v1112_v22 = vpack.c.bf16 %v580_v19, %v578_v18  ;;  %v574_v25 = vadd.f32 1.0, %v1267_v20  ;;  %v1152_v18 = vpack.c.bf16 %v370_v16, %v369_v15  ;;  %v372_v19 = vld [vmem:[#allocation5 + $0x18] sm:$0xff] }
 0x27f   : > { %v581_v33 = vmul.f32 %v573_v23, %v549_v27  ;;  %1135 = vmatpush3.bf16.msra.mxu0 %v1132_v2  ;;  %v1156_v20 = vpack.c.bf16 %v372_v19, %v371_v17 }
 0x280   : > { %v1269_v24 = vpop.eup %1268  ;;  %1113 = vmatprep.subr.bf16.mxu1 %v1112_v22  ;;  %v582_v35 = vmul.f32 %v574_v25, %v550_v30  ;;  %1137 = vmatprep.subr.bf16.mxu0 %v1136_v5  ;;  %v374_v22 = vld [vmem:[#allocation5 + $0x28] sm:$0xff] }
 0x281   : > { %v1271_v26 = vpop.eup %1270  ;;  %v575_v29 = vadd.f32 1.0, %v1269_v24  ;;  %1115 = vmatpush1.bf16.msra.mxu1 %v1114_v21  ;;  %v373_v21 = vld [vmem:[#allocation5 + $0x20] sm:$0xff] }
 0x282   : > { %v576_v32 = vadd.f32 1.0, %v1271_v26  ;;  %v1160_v23 = vpack.c.bf16 %v374_v22, %v373_v21 }
 0x283   : > { %v583_v34 = vmul.f32 %v575_v29, %v551_v28  ;;  %1139 = vmatpush3.bf16.msra.mxu0 %v1136_v5 }
 0x284   : > { %v584_v36 = vmul.f32 %v576_v32, %v552_v31  ;;  %1141 = vmatprep.subr.bf16.mxu0 %v1140_v9  ;;  %v995_v31 = vld [vmem:[%s1710_s1 + $0x2] ss:$0 sm:$0xff] }
 0x285   : > { %v1118_v37 = vpack.c.bf16 %v583_v34, %v581_v33  ;;  %v996_v33 = vld [vmem:[%s1710_s1 + $0x3] ss:$0 sm:$0xff] }
 0x286   : > { %v1116_v38 = vpack.c.bf16 %v584_v36, %v582_v35 }
 0x287   : > { %1143 = vmatpush3.bf16.msra.mxu0 %v1140_v9 }
 0x288   : > { %1117 = vmatprep.subr.bf16.mxu1 %v1116_v38  ;;  %1145 = vmatprep.subr.bf16.mxu0 %v1144_v11 }
 0x289   : > { %1119 = vmatpush1.bf16.msra.mxu1 %v1118_v37 }
 0x28a   : > { %1153 = vmatprep.subr.bf16.mxu1 %v1152_v18 }
 0x28b   : > { %1147 = vmatpush3.bf16.msra.mxu0 %v1144_v11 }
 0x28c   : > { %994 = vmatmul.mubr.msk.f32.vlgmr.msra.gmra.mrb[0].mxu1 %vm590_vm1, %v351_v39  ;;  %1149 = vmatprep.subr.bf16.mxu0 %v1148_v14 }
 0x28d   : > { %1155 = vmatpush3.bf16.msra.mxu1 %v1152_v18 }
 0x28e   : > { %1157 = vmatprep.subr.bf16.mxu1 %v1156_v20 }
 0x28f   : > { %1151 = vmatpush3.bf16.msra.mxu0 %v1148_v14 }
 0x291   : > { %1159 = vmatpush3.bf16.msra.mxu1 %v1156_v20 }
 0x292   : > { %1161 = vmatprep.subr.bf16.mxu1 %v1160_v23 }
 0x295   : > { %1163 = vmatpush3.bf16.msra.mxu1 %v1160_v23 }
 0x35f   : > { %v660_v41 = vpop.f32.mrb[0].mxu1 }
 0x360   : > { %v661_v42 = vadd.f32 %v660_v41, %v588_v40  ;;  %v662_v43 = vpop.f32.mrb[1].mxu1  ;;  %v376_v41 = vld [vmem:[#allocation5 + $0x38] sm:$0xff] }
 0x361   : > { %v663_v44 = vadd.f32 %v662_v43, %v588_v40  ;;  %v375_v40 = vld [vmem:[#allocation5 + $0x30] sm:$0xff]  ;;  %v377_v43 = vld [vmem:[#allocation5 + $0x40] sm:$0xff] }
 0x362   : > { %v1631_v45 = vadd.f32 %v661_v42, %v1589_v1  ;;  %v1164_v42 = vpack.c.bf16 %v376_v41, %v375_v40 }
 0x363   : > { %v1634_v46 = vadd.f32 %v1586_v0, %v663_v44  ;;  %v378_v44 = vld [vmem:[#allocation5 + $0x48] sm:$0xff] }
 0x364   : > { %667 = vadd.xlane.f32.xlu1 %v1631_v45  ;;  %1165 = vmatprep.subr.bf16.mxu1 %v1164_v42  ;;  %v1168_v47 = vpack.c.bf16 %v378_v44, %v377_v43 }
 0x365   : > { %669 = vadd.xlane.f32.xlu0 %v1634_v46  ;;  %1167 = vmatpush3.bf16.msra.mxu1 %v1164_v42 }
 0x366   : > { %1169 = vmatprep.subr.bf16.mxu1 %v1168_v47 }
 0x369   : > { %1171 = vmatpush3.bf16.msra.mxu1 %v1168_v47 }
 0x36a   : > { %1173 = vmatprep.subr.bf16.mxu1 %v1172_v50 }
 0x36d   : > { %1175 = vmatpush3.bf16.msra.mxu1 %v1172_v50 }
 0x3f1   : > { %v668_v53 = vpop.xlane.xlu1 %667 }
 0x3f2   : > { %v671_v1 = vmul.f32 0.0078125, %v668_v53  ;;  %v670_v54 = vpop.xlane.xlu0 %669  ;;  %v1176_v53 = vpack.c.bf16 %v382_v52, %v381_v51 }
 0x3f3   : > { %v672_v55 = vmul.f32 0.0078125, %v670_v54  ;;  %v384_v54 = vld [vmem:[#allocation5 + $0x78] sm:$0xff] }
 0x3f4   : > { %v673_v0 = vsub.f32 %v1631_v45, %v671_v1  ;;  %1177 = vmatprep.subr.bf16.mxu1 %v1176_v53  ;;  %v383_v1 = vld [vmem:[#allocation5 + $0x70] sm:$0xff] }
 0x3f5   : > { %v1640_v56 = vsub.f32 %v1634_v46, %v672_v55  ;;  %1179 = vmatpush3.bf16.msra.mxu1 %v1176_v53  ;;  %v1180_v55 = vpack.c.bf16 %v384_v54, %v383_v1 }
 0x3f6   : > { %v675_v57 = vmul.f32 %v673_v0, %v673_v0 }
 0x3f7   : > { %v676_v58 = vmul.f32 %v1640_v56, %v1640_v56  ;;  %1181 = vmatprep.subr.bf16.mxu1 %v1180_v55 }
 0x3f8   : > { %677 = vadd.xlane.f32.xlu1 %v675_v57 }
 0x3f9   : > { %1183 = vmatpush3.bf16.msra.mxu1 %v1180_v55 }
 0x3fc   : > { %679 = vadd.xlane.f32.xlu1 %v676_v58 }
 0x485   : > { %v678_v24 = vpop.xlane.xlu1 %677 }
 0x486   : > { %v681_v25 = vmul.f32 0.0078125, %v678_v24 }
 0x488   : > { %v683_v26 = vadd.f32 1e-05, %v681_v25 }
 0x489   : > { %v680_v27 = vpop.xlane.xlu1 %679 }
 0x48a   : > { %1272 = vrsqrt.f32 %v683_v26  ;;  %v682_v28 = vmul.f32 0.0078125, %v680_v27 }
 0x48c   : > { %v684_v29 = vadd.f32 1e-05, %v682_v28 }
 0x48e   : > { %1274 = vrsqrt.f32 %v684_v29 }
 0x494   : > { %v1273_v30 = vpop.eup %1272 }
 0x495   : > { %v687_v32 = vmul.f32 %v1273_v30, %v673_v0  ;;  %v997_v0 = vld [vmem:[%s1715_s6] ss:$0 sm:$0xff] }
 0x497   : > { %v693_v34 = vmul.f32 %v995_v31, %v687_v32 }
 0x498   : > { %v1275_v35 = vpop.eup %1274 }
 0x499   : > { %v688_v36 = vmul.f32 %v1275_v35, %v1640_v56  ;;  %v699_v37 = vadd.f32 %v996_v33, %v693_v34 }
 0x49b   : > { %v694_v38 = vmul.f32 %v995_v31, %v688_v36  ;;  %1074 = vmatprep.mubr.f32.mxu0 %v699_v37 }
 0x49d   : > { %v700_v39 = vadd.f32 %v996_v33, %v694_v38 }
 0x49f   : > { %1075 = vmatmul.mubr.f32.vlgmr.msra.gmra.mrb[8].mxu0 %v700_v39 }
 0x572   : > { %v1076_v56 = vpop.f32.mrb[8].mxu0 }
 0x573   : > { %v779_v57 = vadd.f32 %v1076_v56, %v997_v0  ;;  %v773_v58 = vpop.f32.mrb[9].mxu0 }
 0x574   : > { %v774_v59 = vadd.f32 %v997_v0, %v773_v58 }
 0x575   : > { %v785_v60 = vmul.f32 0.70710677, %v779_v57  ;;  %v783_v5 = vmul.f32 0.5, %v779_v57 }
 0x576   : > { %v784_v61 = vmul.f32 0.70710677, %v774_v59  ;;  %v782_v3 = vmul.f32 0.5, %v774_v59 }
 0x577   : > { %1276 = verf.f32 %v785_v60 }
 0x578   : > { %1278 = verf.f32 %v784_v61 }
 0x581   : > { %v1277_v62 = vpop.eup %1276 }
 0x582   : > { %v1279_v63 = vpop.eup %1278  ;;  %v789_v2 = vadd.f32 1.0, %v1277_v62 }
 0x583   : > { %v788_v4 = vadd.f32 1.0, %v1279_v63 }
 0x584   : > { %v791_v7 = vmul.f32 %v789_v2, %v783_v5 }
 0x585   : > { %v790_v6 = vmul.f32 %v788_v4, %v782_v3 }
 0x587   : > { %1109 = vmatprep.mubr.f32.mxu1 %v790_v6 }
 0x588   : > { %1110 = vmatmul.mubr.f32.vlgmr.msra.gmra.mrb[2].mxu1 %v791_v7 }
 0x65b   : > { %v1111_v9 = vpop.f32.mrb[2].mxu1 }
 0x65c   : > { %v868_v10 = vadd.f32 %v1111_v9, %v1634_v46  ;;  %v858_v11 = vpop.f32.mrb[3].mxu1 }
 0x65d   : > { %v867_v12 = vadd.f32 %v858_v11, %v1631_v45 }
 0x65e   : > { %v874_v13 = vadd.f32 %v998_v8, %v868_v10 }
 0x65f   : > { %v873_v14 = vadd.f32 %v998_v8, %v867_v12 }
 0x660   : > { %999 = vst [vmem:[%s329_s12 + $0x8] sm:$0xff] %v874_v13 }
 0x661   : > { %875 = vst [vmem:[%s329_s12] sm:$0xff] %v873_v14 }
 0x662   : > { %1349 = shalt.err (!%p1346_p11)
}
 0x663   : > { %s1350_s23 = scalar_lea.hbm %s1666_s14, 256  ;;  %s1354_s26 = scalar_lea.hbm %s1717_s8, 1024 }
 0x664   : > { %p1351_p13 = scmp.ne.s32.totalorder %s1666_s14, %s1350_s23  ;;  %p1355_p6 = scmp.lt.u32.totalorder %s1666_s14, %s1717_s8 }
 0x665   : > { %p1356_p9 = scmp.lt.u32.totalorder %s1354_s26, %s1350_s23  ;;  %p1358_p12 = scmp.lt.u32.totalorder %s1350_s23, %s1666_s14 }
 0x666   : > { %p1352_p5 = pnand %p1351_p13, %p1733_p1 }
 0x667   : > { %p1357_p10 = por %p1356_p9, %p1355_p6 }
 0x668   : > { %p1353_p0 = pneg %p1352_p5 }
 0x669   : > { %p1359_p2 = por %p1358_p12, %p1357_p10 }
 0x66b   : > { %p1360_p3 = pnand %p1359_p2, %p1353_p0 }
 0x66d   : > { %1363 = shalt.err (!%p1360_p3)
}
 0x66e   : > { %s1415_s18 = smov 128   ;;  %s1416_s19 = smov 8  }
 0x66f   : > { %1192 = dma.vmem_to_hbm [thread:$0]  (%p1733_p1), %s1661_s13, 256, %s1666_s14, %s1668_s9, %s1415_s18, %s1415_s18, %s1416_s19  }
 0x670 PF: > { %p1209_p4 = scmp.ge.s32.totalorder %s1406_s30, 2  ;;  %s907_s29 = sand.u32 1, %s1394_s27  }
 0x671   : > { %p1734_p7 = scmp.ne.s32.totalorder %s1725_s16, 0  ;;  %s908_s20 = scalar_lea.sflag [#allocation4], %s907_s29 }
 0x673   : > { %p1202_p8 = pnand %p1209_p4, %p1734_p7 }
 0x675   : > { %1389 = dma.done.wait (!%p1202_p8), %s908_s20, 256  }
 0x676   : > { %1391 = vsyncadd (!%p1202_p8), %s908_s20, 4294967040  ;;  %s1735_s22 = sld [smem:[#allocation11_spill]]  ;;  %s1736_s29 = sld [smem:[#allocation12_spill]] }
 0x677   : > { %p20_p11 = scmp.ge.s32.totalorder %s1487_s11, 6   ;;  %s1737_s27 = smov %s1398_s28 }
 0x678   : > { %s1739_s30 = smov %s1487_s11 }
 0x679   :  { %22 = sbr.rel (!%p20_p11) target bundleno = 5 (0x5), region = 98 }
 0x67c   : > { %s1738_s28 = smov %s1735_s22 }
 0x680   :  { %913 = vsyncpa [#allocation3], 1 }
 0x681   :  { %915 = vsyncpa [#allocation3 + $0x1], 1 }
 0x682   :  { %916 = vsyncpa [#allocation6], 1 }
 0x683   :  { %917 = vsyncpa [#allocation4], 1 }
 0x684   :  { %919 = vsyncpa [#allocation4 + $0x1], 1 }

</bundles_post_ra>
